<compile_context>
chip_gen: v6e
topology: v6e:2x2x1
jax: 0.10.0
libtpu: 0.0.40
codegen_flags: <defaults>
</compile_context>

<pallas_src>
import functools

import jax
import jax.numpy as jnp
import numpy as np
from jax.experimental import pallas as pl
from jax.experimental.pallas import tpu as pltpu


def _round_up(x, m):
    return (x + m - 1) // m * m


def _make_mlp_kernel(num_layers: int, padded_dim: int, final_act: str):
    """Fused MLP kernel: (Linear+ReLU)*(L-1) then final Linear (+ optional sigmoid)."""
    del padded_dim  # shapes come from the refs

    def kernel(x_ref, w_ref, o_ref):
        h = x_ref[...]                                   # (B_pad, P) f32, lane P-1 == 1.0

        def hidden_body(i, h):
            w = w_ref[i]                                 # (P, P) bf16, bias folded into row P-1
            h = jnp.dot(h.astype(w.dtype), w, preferred_element_type=jnp.float32)
            return jnp.maximum(h, 0.0)                   # ReLU; "ones" lane carries relu(1)=1

        # fori_loop (not a Python for) bounds each weight's vreg live range to a
        # single iteration -> no spill cliff as num_layers / P grows.
        h = jax.lax.fori_loop(0, num_layers - 1, hidden_body, h, unroll=True)

        w_last = w_ref[num_layers - 1]                   # final Linear: no ReLU
        h = jnp.dot(h.astype(w_last.dtype), w_last, preferred_element_type=jnp.float32)
        if final_act == 'sigmoid':
            h = jax.nn.sigmoid(h)
        o_ref[...] = h.astype(o_ref.dtype)

    return kernel


def init_simple_regression(key, input_width, n_output, num_hidden_layers,
                           hidden_layer_size):
    """Deterministic synthetic params matching the PyTorch layer structure.

    Linear(input_width, hl) + ReLU
    [Linear(hl, hl) + ReLU] * (num_hidden_layers - 1)
    Linear(hl, n_output)
    Weights stored as (in, out) == torch_weight.T; biases as (1, out).
    """
    dims = [input_width] + [hidden_layer_size] * num_hidden_layers + [n_output]
    params = []
    for fin, fout in zip(dims[:-1], dims[1:]):
        key, kw, kb = jax.random.split(key, 3)
        scale = 1.0 / jnp.sqrt(jnp.float32(fin))
        w = jax.random.normal(kw, (fin, fout), jnp.float32) * scale
        b = jax.random.normal(kb, (1, fout), jnp.float32) * 0.01
        params.append((w, b))
    return params, key


def pack_params(params, dtype=jnp.bfloat16):
    """Pack every layer's (W, b) into one bf16 lane/sublane-padded buffer.

    Returns (packed, P) where packed has shape (L, P, P):
      packed[i, :in_i,       :out_i]   = W_i
      packed[i, P-1,         :out_i]   = b_i          (bias row, hit by the "ones" lane)
      packed[i, P-1,         P-1]      = 1.0          (carries the 1 through ReLU layers)
    Zero padding is exact in the meaningful lanes: padded input lanes multiply
    zero weight rows, padded output lanes get zero columns, and the reserved
    ones-lane only ever contributes the bias.  Built with NumPy once at init
    time (no traced .at[].set chain); reuse the returned device array.
    """
    num_layers = len(params)
    dims = [params[0][0].shape[0]] + [w.shape[1] for (w, _) in params]
    P = _round_up(max(dims) + 1, 128)                    # +1 reserves the ones lane
    ones_lane = P - 1
    packed = np.zeros((num_layers, P, P), np.float32)
    for i, (w, b) in enumerate(params):
        fin, fout = w.shape
        packed[i, :fin, :fout] = np.asarray(w)
        packed[i, ones_lane, :fout] = np.asarray(b).reshape(-1)
        packed[i, ones_lane, ones_lane] = 1.0
    return jnp.asarray(packed, dtype=dtype), P


@functools.partial(jax.jit, static_argnames=('n_output', 'final_act'))
def simple_regression_forward(x, packed_params, n_output, final_act='none'):
    """Run the whole SimpleRegression stack in a single Pallas kernel."""
    B, in_width = x.shape
    num_layers, P, _ = packed_params.shape
    B_pad = _round_up(max(B, 8), 8)                      # fill f32 sublanes (free)
    ones_lane = P - 1
    # Single small fusion: zero-pad + set the bias "ones" lane.
    x_pad = (jnp.zeros((B_pad, P), jnp.float32)
             .at[:, ones_lane].set(1.0)
             .at[:B, :in_width].set(x))

    kernel = _make_mlp_kernel(num_layers, P, final_act)
    flops = 2 * B_pad * P * P * num_layers
    transcendentals = B_pad * P if final_act == 'sigmoid' else 0
    bytes_accessed = (x_pad.size * 4
                      + packed_params.size * packed_params.dtype.itemsize
                      + B_pad * P * 4)
    out_pad = pl.pallas_call(
        kernel,
        out_shape=jax.ShapeDtypeStruct((B_pad, P), jnp.float32),
        # No grid: whole (tiny) arrays are single VMEM-resident blocks.
        in_specs=[pl.BlockSpec(memory_space=pltpu.MemorySpace.VMEM)] * 2,
        out_specs=pl.BlockSpec(memory_space=pltpu.MemorySpace.VMEM),
        cost_estimate=pl.CostEstimate(flops=flops,
                                      transcendentals=transcendentals,
                                      bytes_accessed=bytes_accessed),
    )(x_pad, packed_params)
    return out_pad[:B, :n_output]


def simple_regression_reference(x, params, final_act='none'):
    """Pure-JAX f32 reference of the original module math."""
    h = x
    for i, (w, b) in enumerate(params):
        h = h @ w + b
        if i < len(params) - 1:
            h = jnp.maximum(h, 0.0)
    if final_act == 'sigmoid':
        h = jax.nn.sigmoid(h)
    return h


def simple_regression_reference_bf16(x, params, final_act='none'):
    """Reference that emulates the kernel numerics (bf16 weights/acts, f32 accum)."""
    h = x
    for i, (w, b) in enumerate(params):
        w16 = w.astype(jnp.bfloat16)
        b16 = b.astype(jnp.bfloat16).astype(jnp.float32)
        h = jnp.dot(h.astype(jnp.bfloat16), w16,
                    preferred_element_type=jnp.float32) + b16
        if i < len(params) - 1:
            h = jnp.maximum(h, 0.0)
    if final_act == 'sigmoid':
        h = jax.nn.sigmoid(h)
    return h


if __name__ == "__main__":
    # SimpleRegression(input_width=24, n_output=1, num_hidden_layers=2,
    #                  hidden_layer_size=32, final_act='none', dropout=0.2)
    # nn.Dropout is the identity in eval mode, which is what we reproduce here.
    B = 2
    INPUT_WIDTH = 24
    N_OUTPUT = 1
    NUM_HIDDEN_LAYERS = 2
    HIDDEN_LAYER_SIZE = 32
    FINAL_ACT = 'none'

    key = jax.random.PRNGKey(0)
    params, key = init_simple_regression(key, INPUT_WIDTH, N_OUTPUT,
                                         NUM_HIDDEN_LAYERS, HIDDEN_LAYER_SIZE)
    packed, P = pack_params(params)          # pack ONCE; reuse across calls

    key, kx = jax.random.split(key)
    x = jax.random.normal(kx, (B, INPUT_WIDTH), jnp.float32)

    out = simple_regression_forward(x, packed, n_output=N_OUTPUT,
                                    final_act=FINAL_ACT)
    out = jax.block_until_ready(out)
    assert out.shape == (B, N_OUTPUT), out.shape

    # 1) Kernel math matches a reference with the same bf16 weight storage.
    ref16 = simple_regression_reference_bf16(x, params, FINAL_ACT)
    assert jnp.allclose(out, ref16, atol=1e-2, rtol=1e-2), (out, ref16)
    # 2) bf16 storage stays close to the full-f32 module semantics.
    ref32 = simple_regression_reference(x, params, FINAL_ACT)
    assert jnp.allclose(out, ref32, atol=5e-2, rtol=5e-2), (out, ref32)

    print("KERNEL_OK")
</pallas_src>

<mosaic_0001>
module attributes {stable_mosaic.version = 11 : i64} {
  func.func @kernel(%arg0: memref<8x128xf32, #tpu.memory_space<vmem>>, %arg1: memref<3x128x128xbf16, #tpu.memory_space<vmem>>, %arg2: memref<8x128xf32, #tpu.memory_space<vmem>>) attributes {dimension_semantics = [], scalar_prefetch = 0 : i64, scratch_operands = 0 : i64, tpu.core_type = #tpu.core_type<tc>} {
    %c0 = arith.constant 0 : index
    %c0_0 = arith.constant 0 : index
    %0 = vector.load %arg0[%c0, %c0_0] : memref<8x128xf32, #tpu.memory_space<vmem>>, vector<8x128xf32>
    %c0_i32 = arith.constant 0 : i32
    %1 = arith.index_cast %c0_i32 : i32 to index
    %c0_1 = arith.constant 0 : index
    %c0_2 = arith.constant 0 : index
    %2 = vector.load %arg1[%1, %c0_1, %c0_2] : memref<3x128x128xbf16, #tpu.memory_space<vmem>>, vector<1x128x128xbf16>
    %3 = vector.shape_cast %2 : vector<1x128x128xbf16> to vector<128x128xbf16>
    %4 = arith.truncf %0 : vector<8x128xf32> to vector<8x128xbf16>
    %cst = arith.constant dense<0.000000e+00> : vector<8x128xf32>
    %5 = tpu.matmul %4, %3, %cst {dimension_numbers = #tpu.dot_dimension_numbers<[1], [0], [0], [1], [0, 0, 1, 1], [], []>} : vector<8x128xbf16>, vector<128x128xbf16>, vector<8x128xf32> -> vector<8x128xf32>
    %cst_3 = arith.constant 0.000000e+00 : f32
    %6 = vector.broadcast %cst_3 : f32 to vector<8x128xf32>
    %7 = arith.maximumf %5, %6 : vector<8x128xf32>
    %c1_i32 = arith.constant 1 : i32
    %8 = arith.index_cast %c1_i32 : i32 to index
    %c0_4 = arith.constant 0 : index
    %c0_5 = arith.constant 0 : index
    %9 = vector.load %arg1[%8, %c0_4, %c0_5] : memref<3x128x128xbf16, #tpu.memory_space<vmem>>, vector<1x128x128xbf16>
    %10 = vector.shape_cast %9 : vector<1x128x128xbf16> to vector<128x128xbf16>
    %11 = arith.truncf %7 : vector<8x128xf32> to vector<8x128xbf16>
    %cst_6 = arith.constant dense<0.000000e+00> : vector<8x128xf32>
    %12 = tpu.matmul %11, %10, %cst_6 {dimension_numbers = #tpu.dot_dimension_numbers<[1], [0], [0], [1], [0, 0, 1, 1], [], []>} : vector<8x128xbf16>, vector<128x128xbf16>, vector<8x128xf32> -> vector<8x128xf32>
    %cst_7 = arith.constant 0.000000e+00 : f32
    %13 = vector.broadcast %cst_7 : f32 to vector<8x128xf32>
    %14 = arith.maximumf %12, %13 : vector<8x128xf32>
    %c2_i32 = arith.constant 2 : i32
    %c2 = arith.constant 2 : index
    %c0_8 = arith.constant 0 : index
    %c0_9 = arith.constant 0 : index
    %15 = vector.load %arg1[%c2, %c0_8, %c0_9] : memref<3x128x128xbf16, #tpu.memory_space<vmem>>, vector<1x128x128xbf16>
    %16 = vector.shape_cast %15 : vector<1x128x128xbf16> to vector<128x128xbf16>
    %17 = arith.truncf %14 : vector<8x128xf32> to vector<8x128xbf16>
    %cst_10 = arith.constant dense<0.000000e+00> : vector<8x128xf32>
    %18 = tpu.matmul %17, %16, %cst_10 {dimension_numbers = #tpu.dot_dimension_numbers<[1], [0], [0], [1], [0, 0, 1, 1], [], []>} : vector<8x128xbf16>, vector<128x128xbf16>, vector<8x128xf32> -> vector<8x128xf32>
    %c0_11 = arith.constant 0 : index
    %c0_12 = arith.constant 0 : index
    %19 = vector.load %arg2[%c0_11, %c0_12] : memref<8x128xf32, #tpu.memory_space<vmem>>, vector<8x128xf32>
    tpu.vector_store %arg2[%c0_11, %c0_12], %18 {strides = array<i32>} : memref<8x128xf32, #tpu.memory_space<vmem>>, vector<8x128xf32>,
    return
  }
}

</mosaic_0001>

<bundles_post_ra>
// kernel: simple_regression_forward.1
= control target key start
LH: loop header
LB: loop body
LE: loop exit
PB: predicated region body
PF: predicated region fallthrough
CT: control target
= control target key end

     0   :  { %7 = vsyncpa [#allocation3], 0  ;;  %s514_s9 = smov [#allocation2]   ;;  %s573_s0 = inlined_call_operand.vmem [shape: f32[8,128], index: 0, kind: input, shape index: {}]   ;;  %s574_s1 = inlined_call_operand.hbm [shape: bf16[3,128,128], index: 1, kind: input, shape index: {}]   ;;  %s575_s2 = inlined_call_operand.vmem [shape: f32[8,128], index: 2, kind: output, shape index: {}]  }
   0x1   :  { %s15_s10 = sshll.u32 %s514_s9, 4  ;;  %s16_s10 = int_to_ptr.vmem [resolvable:$true] %s15_s10 }
   0x2   :  { %s500_s11 = scalar_lea.vmem %s16_s10, 3072  ;;  %p505_p1 = scmp.lt.s32.totalorder %s16_s10, %s16_s10 }
   0x3   :  { %p501_p0 = scmp.ne.s32.totalorder %s16_s10, %s500_s11  ;;  %p506_p2 = scmp.lt.s32.totalorder %s500_s11, %s500_s11 }
   0x5   :  { %p507_p3 = por %p506_p2, %p505_p1 }
   0x7   :  { %p508_p4 = pnand %p507_p3, %p501_p0 }
   0x9   :  { %511 = shalt.err (!%p508_p4)
}
   0xa   :  { %s515_s12 = smov 64   ;;  %s516_s13 = smov 4  }
   0xb   :  { %21 = dma.hbm_to_vmem [thread:$0]  %s574_s1, 3072, %s16_s10, [#allocation3], %s515_s12, %s515_s12, %s516_s13  }
   0xc   :  { %512 = dma.done.wait [#allocation3], 3072  }
   0xd   :  { %513 = vsyncadd [#allocation3], 4294964224  ;;  %v517_v0 = vmov 0.0   ;;  %vm518_vm0 = vmmov 0   ;;  %v468_v1 = vld [vmem:[#allocation2 + $0x38] sm:$0xff]   ;;  %v469_v2 = vld [vmem:[#allocation2 + $0x30] sm:$0xff]  }
   0xe   :  { %403 = vmatprep.subr.bf16.mxu0 %v517_v0  ;;  %419 = vmatprep.mubr.msk.bf16.mxu0 %vm518_vm0, %v517_v0  ;;  %v470_v3 = vld [vmem:[#allocation2 + $0x28] sm:$0xff]   ;;  %v476_v4 = vld [vmem:[#allocation2 + $0x78] sm:$0xff]   ;;  %v471_v5 = vld [vmem:[#allocation2 + $0x20] sm:$0xff]  }
   0xf   :  { %423 = vmatprep.subr.bf16.mxu1 %v517_v0  ;;  %439 = vmatprep.mubr.msk.bf16.mxu1 %vm518_vm0, %v517_v0  ;;  %v477_v6 = vld [vmem:[#allocation2 + $0x70] sm:$0xff]   ;;  %v472_v7 = vld [vmem:[#allocation2 + $0x18] sm:$0xff]   ;;  %v478_v8 = vld [vmem:[#allocation2 + $0x68] sm:$0xff]  }
  0x10   :  { %404 = vmatpush3.bf16.msra.mxu0 %v468_v1  ;;  %424 = vmatpush3.bf16.msra.mxu1 %v476_v4  ;;  %v473_v9 = vld [vmem:[#allocation2 + $0x10] sm:$0xff]   ;;  %v479_v10 = vld [vmem:[#allocation2 + $0x60] sm:$0xff]   ;;  %v474_v11 = vld [vmem:[#allocation2 + $0x8] sm:$0xff]  }
  0x11   :  { %405 = vmatprep.subr.bf16.mxu0 %v517_v0  ;;  %425 = vmatprep.subr.bf16.mxu1 %v517_v0  ;;  %v480_v12 = vld [vmem:[#allocation2 + $0x58] sm:$0xff]   ;;  %v475_v13 = vld [vmem:[#allocation2] sm:$0xff]   ;;  %v481_v15 = vld [vmem:[#allocation2 + $0x50] sm:$0xff]  }
  0x12   :  { %v26_v14 = vld [vmem:[%s573_s0] sm:$0xff]  ;;  %v482_v17 = vld [vmem:[#allocation2 + $0x48] sm:$0xff]   ;;  %v484_v19 = vld [vmem:[#allocation2 + $0xb8] sm:$0xff]  }
  0x13   :  { %v43_v16 = vpack.c.bf16 %v26_v14, %v26_v14  ;;  %v483_v18 = vld [vmem:[#allocation2 + $0x40] sm:$0xff]   ;;  %v485_v20 = vld [vmem:[#allocation2 + $0xb0] sm:$0xff]   ;;  %v486_v21 = vld [vmem:[#allocation2 + $0xa8] sm:$0xff]  }
  0x14   :  { %406 = vmatpush3.bf16.msra.mxu0 %v469_v2  ;;  %426 = vmatpush3.bf16.msra.mxu1 %v477_v6  ;;  %v487_v22 = vld [vmem:[#allocation2 + $0xa0] sm:$0xff]   ;;  %v488_v23 = vld [vmem:[#allocation2 + $0x98] sm:$0xff]   ;;  %v489_v24 = vld [vmem:[#allocation2 + $0x90] sm:$0xff]  }
  0x15   :  { %407 = vmatprep.subr.bf16.mxu0 %v517_v0  ;;  %427 = vmatprep.subr.bf16.mxu1 %v517_v0  ;;  %v490_v25 = vld [vmem:[#allocation2 + $0x88] sm:$0xff]   ;;  %v491_v32 = vld [vmem:[#allocation2 + $0x80] sm:$0xff]  }
  0x18   :  { %408 = vmatpush3.bf16.msra.mxu0 %v470_v3  ;;  %428 = vmatpush3.bf16.msra.mxu1 %v478_v8 }
  0x19   :  { %409 = vmatprep.subr.bf16.mxu0 %v517_v0  ;;  %429 = vmatprep.subr.bf16.mxu1 %v517_v0 }
  0x1c   :  { %410 = vmatpush3.bf16.msra.mxu0 %v471_v5  ;;  %430 = vmatpush3.bf16.msra.mxu1 %v479_v10 }
  0x1d   :  { %411 = vmatprep.subr.bf16.mxu0 %v517_v0  ;;  %431 = vmatprep.subr.bf16.mxu1 %v517_v0 }
  0x20   :  { %412 = vmatpush3.bf16.msra.mxu0 %v472_v7  ;;  %432 = vmatpush3.bf16.msra.mxu1 %v480_v12 }
  0x21   :  { %413 = vmatprep.subr.bf16.mxu0 %v517_v0  ;;  %433 = vmatprep.subr.bf16.mxu1 %v517_v0 }
  0x24   :  { %414 = vmatpush3.bf16.msra.mxu0 %v473_v9  ;;  %434 = vmatpush3.bf16.msra.mxu1 %v481_v15 }
  0x25   :  { %415 = vmatprep.subr.bf16.mxu0 %v517_v0  ;;  %435 = vmatprep.subr.bf16.mxu1 %v517_v0 }
  0x28   :  { %416 = vmatpush3.bf16.msra.mxu0 %v474_v11  ;;  %436 = vmatpush3.bf16.msra.mxu1 %v482_v17 }
  0x29   :  { %417 = vmatprep.subr.bf16.mxu0 %v517_v0  ;;  %437 = vmatprep.subr.bf16.mxu1 %v517_v0 }
  0x2c   :  { %418 = vmatpush3.bf16.msra.mxu0 %v475_v13  ;;  %438 = vmatpush3.bf16.msra.mxu1 %v483_v18 }
  0x2d   :  { %443 = vmatprep.subr.bf16.mxu0 %v517_v0 }
  0x2f   :  { %420 = vmatmul.mubr.bf16.vlgmr.msra.gmra.mxu0 %v43_v16 }
  0x30   :  { %459 = vmatprep.mubr.msk.bf16.mxu0 %vm518_vm0, %v517_v0  ;;  %444 = vmatpush3.bf16.msra.mxu0 %v484_v19 }
  0x31   :  { %445 = vmatprep.subr.bf16.mxu0 %v517_v0 }
  0x34   :  { %446 = vmatpush3.bf16.msra.mxu0 %v485_v20 }
  0x35   :  { %447 = vmatprep.subr.bf16.mxu0 %v517_v0 }
  0x38   :  { %448 = vmatpush3.bf16.msra.mxu0 %v486_v21 }
  0x39   :  { %449 = vmatprep.subr.bf16.mxu0 %v517_v0 }
  0x3c   :  { %450 = vmatpush3.bf16.msra.mxu0 %v487_v22 }
  0x3d   :  { %451 = vmatprep.subr.bf16.mxu0 %v517_v0 }
  0x40   :  { %452 = vmatpush3.bf16.msra.mxu0 %v488_v23 }
  0x41   :  { %453 = vmatprep.subr.bf16.mxu0 %v517_v0 }
  0x44   :  { %454 = vmatpush3.bf16.msra.mxu0 %v489_v24 }
  0x45   :  { %455 = vmatprep.subr.bf16.mxu0 %v517_v0 }
  0x48   :  { %456 = vmatpush3.bf16.msra.mxu0 %v490_v25 }
  0x49   :  { %457 = vmatprep.subr.bf16.mxu0 %v517_v0 }
  0x4c   :  { %458 = vmatpush3.bf16.msra.mxu0 %v491_v32 }
  0xef   :  { %v126_v26 = vpop.f32.mrf.mxu0 }
  0xf0   :  { %v132_v27 = vmax.f32 %v126_v26, 0.0 }
  0xf1   :  { %v421_v28 = vpop.f32.mrf.mxu0 }
  0xf2   :  { %v150_v29 = vpack.c.bf16 %v132_v27, %v132_v27 }
  0xf3   :  { %v129_v30 = vpop.f32.mrf.mxu0 }
  0xf4   :  { %440 = vmatmul.mubr.bf16.vlgmr.msra.gmra.mxu1 %v150_v29 }
  0xf5   :  { %v422_v31 = vpop.f32.mrf.mxu0 }
 0x1b4   :  { %v233_v33 = vpop.f32.mrf.mxu1 }
 0x1b5   :  { %v239_v34 = vmax.f32 %v233_v33, 0.0 }
 0x1b6   :  { %v441_v35 = vpop.f32.mrf.mxu1 }
 0x1b7   :  { %v257_v36 = vpack.c.bf16 %v239_v34, %v239_v34 }
 0x1b8   :  { %v236_v37 = vpop.f32.mrf.mxu1 }
 0x1b9   :  { %460 = vmatmul.mubr.bf16.vlgmr.msra.gmra.mxu0 %v257_v36 }
 0x1ba   :  { %v442_v38 = vpop.f32.mrf.mxu1 }
 0x279   :  { %v340_v39 = vpop.f32.mrf.mxu0 }
 0x27a   :  { %346 = vst [vmem:[%s575_s2] sm:$0xff] %v340_v39 }
 0x27b   :  { %v461_v40 = vpop.f32.mrf.mxu0 }
 0x27d   :  { %v343_v41 = vpop.f32.mrf.mxu0 }
 0x27f   :  { %v462_v42 = vpop.f32.mrf.mxu0 }
 0x280   :  { %351 = vsyncpa [#allocation3], 1 }

</bundles_post_ra>
